<compile_context>
chip_gen: v7x
topology: tpu7x:2x2x1
jax: 0.10.0
libtpu: 0.0.40
codegen_flags: <defaults>
</compile_context>

<pallas_src>
import jax
import jax.numpy as jnp
from jax.experimental import pallas as pl
from jax.experimental.pallas import tpu as pltpu


def _fused_matmul_kernel(w_ref, b_ref, p_ref, o_ref):
    """O = W @ P + b for one lane-dense M tile.

    w_ref: (Cout_p, KKC)  pool-fused, flattened conv weights (compute dtype)
    b_ref: (Cout_p, 1)    bias (f32)
    p_ref: (KKC, bm)      transposed im2col patches for this tile (compute dtype)
    o_ref: (Cout_p, bm)   pooled conv output tile (output dtype)
    """
    acc = jnp.dot(w_ref[...], p_ref[...], preferred_element_type=jnp.float32)
    acc = acc + b_ref[...].astype(jnp.float32)          # broadcast over lanes
    o_ref[...] = acc.astype(o_ref.dtype)


def _pick_block_m(m_total, kkc, cout, in_dsize, out_dsize, budget_bytes=20 << 20):
    """Largest lane-dense M tile that fits the VMEM budget; prefer >= 2 grid steps."""
    def tile_bytes(bm):
        return (2 * kkc * bm * in_dsize        # double-buffered patches tile
                + 2 * cout * bm * out_dsize    # double-buffered output tile
                + 2 * cout * kkc * in_dsize    # fused weights (worst case 2 buffers)
                + 2 * cout * 4)                # bias
    fitting = [c for c in (1024, 512, 256, 128)
               if m_total % c == 0 and tile_bytes(c) <= budget_bytes]
    if fitting:
        bm = fitting[0]
        if m_total // bm < 2:                  # try to feed both v7x TensorCores
            multi = [c for c in fitting if m_total // c >= 2]
            if multi:
                bm = multi[0]
    else:
        bm = m_total                           # tiny / irregular M: one full block
    return bm, tile_bytes(bm)


def conv_mean_pool(x_nchw, w_oihw, b, *, compute_dtype=None, nchw_output=True):
    """ConvMeanPool forward.  x_nchw: (N, Cin, H, W) -> (N, Cout, H//2, W//2)."""
    N, Cin, H, W = x_nchw.shape
    Cout, _, K, _ = w_oihw.shape
    assert K % 2 == 1, "kernel_size must be odd (padding = K // 2)"
    assert H % 2 == 0 and W % 2 == 0, "H and W must be even for 2x2 mean pool"
    pad = K // 2
    Kf = K + 1                       # pool-fused kernel size (stride-2 conv)
    Ho, Wo = H // 2, W // 2
    M = N * Ho * Wo                  # pooled output pixels across the batch
    KKC = Kf * Kf * Cin              # fused im2col contraction depth

    in_dtype = (jnp.dtype(compute_dtype) if compute_dtype is not None
                else jnp.dtype(x_nchw.dtype))
    out_dtype = jnp.dtype(x_nchw.dtype)
    in_dsize, out_dsize = in_dtype.itemsize, out_dtype.itemsize
    sublane = 8 * (4 // in_dsize) if in_dsize <= 4 else 8
    Cout_p = -(-Cout // sublane) * sublane     # pad Cout to a full-sublane multiple

    # ---- weight prep: fold the 2x2 mean pool into the conv kernel (f32 math) -----
    # W4[a, b] = 0.25 * sum_{dh,dw in {0,1}} w[a-dh, b-dw]   (zero out of range)
    w_hwio = jnp.transpose(w_oihw, (2, 3, 1, 0)).astype(jnp.float32)  # (K,K,Cin,Cout)
    w4 = jnp.zeros((Kf, Kf, Cin, Cout), jnp.float32)
    for dh in (0, 1):
        for dw in (0, 1):
            w4 = w4.at[dh:dh + K, dw:dw + K].add(w_hwio)
    w4 = w4 * 0.25
    w_t = w4.reshape(KKC, Cout).T.astype(in_dtype)                    # (Cout, KKC)
    b2d = b.reshape(Cout, 1).astype(jnp.float32)
    if Cout_p != Cout:
        w_t = jnp.pad(w_t, ((0, Cout_p - Cout), (0, 0)))
        b2d = jnp.pad(b2d, ((0, Cout_p - Cout), (0, 0)))

    # ---- input prep: transposed im2col slab, built directly in the compute dtype --
    # P[(a*Kf + b)*Cin + c, n*Ho*Wo + p*Wo + q] = x_pad[n, 2p + a, 2q + b, c]
    x_nhwc = jnp.transpose(x_nchw, (0, 2, 3, 1)).astype(in_dtype)
    xp = jnp.pad(x_nhwc, ((0, 0), (pad, pad), (pad, pad), (0, 0)))
    taps = [xp[:, a:a + H:2, bb:bb + W:2, :]
            for a in range(Kf) for bb in range(Kf)]                   # (N,Ho,Wo,Cin) each
    patches = jnp.stack(taps, axis=0)                                 # (Kf*Kf,N,Ho,Wo,Cin)
    patches = jnp.transpose(patches, (0, 4, 1, 2, 3)).reshape(KKC, M)  # lane-dense LHS

    # ---- tiling / VMEM budgeting --------------------------------------------------
    bm, tile_bytes = _pick_block_m(M, KKC, Cout_p, in_dsize, out_dsize)
    vmem_limit = int(min(max(2 * tile_bytes, 32 << 20), 48 << 20))
    grid = (M // bm,)

    def run(single_buffer_invariants):
        inv_kw = (dict(pipeline_mode=pl.Buffered(1))
                  if single_buffer_invariants else {})
        return pl.pallas_call(
            _fused_matmul_kernel,
            out_shape=jax.ShapeDtypeStruct((Cout_p, M), out_dtype),
            grid=grid,
            in_specs=[
                pl.BlockSpec((Cout_p, KKC), lambda i: (0, 0), **inv_kw),  # fused weights
                pl.BlockSpec((Cout_p, 1), lambda i: (0, 0), **inv_kw),    # bias
                pl.BlockSpec((KKC, bm), lambda i: (0, i)),                # patches tile
            ],
            out_specs=pl.BlockSpec((Cout_p, bm), lambda i: (0, i)),
            compiler_params=pltpu.CompilerParams(
                dimension_semantics=("parallel",),
                vmem_limit_bytes=vmem_limit),
        )(w_t, b2d, patches)

    try:
        out = run(True)        # grid-invariant operands single-buffered (saves VMEM)
    except Exception:          # pl.Buffered(1) unsupported on this stack: safe fallback
        out = run(False)

    out = out[:Cout].reshape(Cout, N, Ho, Wo)
    if not nchw_output:
        return out             # (Cout, N, Ho, Wo): skips the extra HBM relayout pass
    # Kept only to match the PyTorch module's NCHW output; a whole memory-bound pass.
    return jnp.transpose(out, (1, 0, 2, 3))


def _reference(x_nchw, w_oihw, b):
    out = jax.lax.conv_general_dilated(
        x_nchw, w_oihw, window_strides=(1, 1), padding="SAME",
        dimension_numbers=("NCHW", "OIHW", "NCHW"),
        precision=jax.lax.Precision.HIGHEST,
    ) + b[None, :, None, None]
    return (out[:, :, ::2, ::2] + out[:, :, 1::2, ::2]
            + out[:, :, ::2, 1::2] + out[:, :, 1::2, 1::2]) / 4.0


if __name__ == "__main__":
    # ConvMeanPool(input_dim=4, output_dim=8, kernel_size=3, biases=True)
    N, Cin, H, W = 2, 4, 16, 16
    Cout, K = 8, 3

    key = jax.random.PRNGKey(0)
    kx, kw, kb = jax.random.split(key, 3)
    x = jax.random.normal(kx, (N, Cin, H, W), dtype=jnp.float32)
    fan_in = Cin * K * K
    w = jax.random.uniform(kw, (Cout, Cin, K, K), jnp.float32,
                           minval=-1.0, maxval=1.0) / jnp.sqrt(fan_in)
    b = jax.random.uniform(kb, (Cout,), jnp.float32,
                           minval=-1.0, maxval=1.0) / jnp.sqrt(fan_in)

    ref = _reference(x, w, b)

    # f32 path (matches the PyTorch module's numerics).
    out = jax.block_until_ready(conv_mean_pool(x, w, b))
    assert out.shape == (N, Cout, H // 2, W // 2), out.shape
    assert jnp.allclose(out, ref, atol=1e-3, rtol=1e-3), float(
        jnp.max(jnp.abs(out - ref)))

    # bf16 MXU-input path (operands cast in the wrapper; f32 accumulation).
    out_bf16 = jax.block_until_ready(
        conv_mean_pool(x, w, b, compute_dtype=jnp.bfloat16))
    assert out_bf16.shape == (N, Cout, H // 2, W // 2), out_bf16.shape
    assert jnp.allclose(out_bf16, ref, atol=5e-2, rtol=5e-2), float(
        jnp.max(jnp.abs(out_bf16 - ref)))

    print("KERNEL_OK")
</pallas_src>

<mosaic_0001>
module attributes {stable_mosaic.version = 11 : i64} {
  func.func @_fused_matmul_kernel(%arg0: i32, %arg1: memref<8x64xf32, #tpu.memory_space<vmem>>, %arg2: memref<8x1xf32, #tpu.memory_space<vmem>>, %arg3: memref<64x128xf32, #tpu.memory_space<vmem>>, %arg4: memref<8x128xf32, #tpu.memory_space<vmem>>) attributes {dimension_semantics = [#tpu.dimension_semantics<parallel>], iteration_bounds = array<i64: 1>, scalar_prefetch = 0 : i64, scratch_operands = 0 : i64, tpu.core_type = #tpu.core_type<tc>, window_params = [{pipeline_mode = #tpu.pipeline_mode<synchronous>, transform_indices = @transform_0, window_bounds = array<i64: 8, 64>}, {pipeline_mode = #tpu.pipeline_mode<synchronous>, transform_indices = @transform_1, window_bounds = array<i64: 8, 1>}, {transform_indices = @transform_2, window_bounds = array<i64: 64, 128>}, {transform_indices = @transform_3, window_bounds = array<i64: 8, 128>}]} {
    %c0 = arith.constant 0 : index
    %c0_0 = arith.constant 0 : index
    %0 = vector.load %arg1[%c0, %c0_0] : memref<8x64xf32, #tpu.memory_space<vmem>>, vector<8x64xf32>
    %c0_1 = arith.constant 0 : index
    %c0_2 = arith.constant 0 : index
    %1 = vector.load %arg3[%c0_1, %c0_2] : memref<64x128xf32, #tpu.memory_space<vmem>>, vector<64x128xf32>
    %cst = arith.constant dense<0.000000e+00> : vector<8x128xf32>
    %2 = tpu.matmul %0, %1, %cst {dimension_numbers = #tpu.dot_dimension_numbers<[1], [0], [0], [1], [0, 0, 1, 1], [], []>} : vector<8x64xf32>, vector<64x128xf32>, vector<8x128xf32> -> vector<8x128xf32>
    %c0_3 = arith.constant 0 : index
    %c0_4 = arith.constant 0 : index
    %3 = vector.load %arg2[%c0_3, %c0_4] : memref<8x1xf32, #tpu.memory_space<vmem>>, vector<8x1xf32>
    %4 = vector.broadcast %3 : vector<8x1xf32> to vector<8x128xf32>
    %5 = arith.addf %2, %4 : vector<8x128xf32>
    %c0_5 = arith.constant 0 : index
    %c0_6 = arith.constant 0 : index
    %6 = vector.load %arg4[%c0_5, %c0_6] : memref<8x128xf32, #tpu.memory_space<vmem>>, vector<8x128xf32>
    tpu.vector_store %arg4[%c0_5, %c0_6], %5 {strides = array<i32>} : memref<8x128xf32, #tpu.memory_space<vmem>>, vector<8x128xf32>,
    return
  }
  func.func @transform_0(%arg0: i32) -> (i32, i32) {
    %c0_i32 = arith.constant 0 : i32
    %c0_i32_0 = arith.constant 0 : i32
    %c0_i32_1 = arith.constant 0 : i32
    return %c0_i32, %c0_i32_0 : i32, i32
  }
  func.func @transform_1(%arg0: i32) -> (i32, i32) {
    %c0_i32 = arith.constant 0 : i32
    %c0_i32_0 = arith.constant 0 : i32
    %c0_i32_1 = arith.constant 0 : i32
    return %c0_i32, %c0_i32_0 : i32, i32
  }
  func.func @transform_2(%arg0: i32) -> (i32, i32) {
    %c0_i32 = arith.constant 0 : i32
    %c0_i32_0 = arith.constant 0 : i32
    return %c0_i32, %arg0 : i32, i32
  }
  func.func @transform_3(%arg0: i32) -> (i32, i32) {
    %c0_i32 = arith.constant 0 : i32
    %c0_i32_0 = arith.constant 0 : i32
    return %c0_i32, %arg0 : i32, i32
  }
}

module attributes {stable_mosaic.version = 11 : i64} {
  func.func @_fused_matmul_kernel(%arg0: i32, %arg1: memref<8x64xf32, #tpu.memory_space<vmem>>, %arg2: memref<8x1xf32, #tpu.memory_space<vmem>>, %arg3: memref<64x128xf32, #tpu.memory_space<vmem>>, %arg4: memref<8x128xf32, #tpu.memory_space<vmem>>) attributes {dimension_semantics = [#tpu.dimension_semantics<parallel>], iteration_bounds = array<i64: 1>, scalar_prefetch = 0 : i64, scratch_operands = 0 : i64, tpu.core_type = #tpu.core_type<tc>, window_params = [{pipeline_mode = #tpu.pipeline_mode<synchronous>, transform_indices = @transform_0, window_bounds = array<i64: 8, 64>}, {pipeline_mode = #tpu.pipeline_mode<synchronous>, transform_indices = @transform_1, window_bounds = array<i64: 8, 1>}, {transform_indices = @transform_2, window_bounds = array<i64: 64, 128>}, {transform_indices = @transform_3, window_bounds = array<i64: 8, 128>}]} {
    %c0 = arith.constant 0 : index
    %c0_0 = arith.constant 0 : index
    %0 = vector.load %arg1[%c0, %c0_0] : memref<8x64xf32, #tpu.memory_space<vmem>>, vector<8x64xf32>
    %c0_1 = arith.constant 0 : index
    %c0_2 = arith.constant 0 : index
    %1 = vector.load %arg3[%c0_1, %c0_2] : memref<64x128xf32, #tpu.memory_space<vmem>>, vector<64x128xf32>
    %cst = arith.constant dense<0.000000e+00> : vector<8x128xf32>
    %2 = tpu.matmul %0, %1, %cst {dimension_numbers = #tpu.dot_dimension_numbers<[1], [0], [0], [1], [0, 0, 1, 1], [], []>} : vector<8x64xf32>, vector<64x128xf32>, vector<8x128xf32> -> vector<8x128xf32>
    %c0_3 = arith.constant 0 : index
    %c0_4 = arith.constant 0 : index
    %3 = vector.load %arg2[%c0_3, %c0_4] : memref<8x1xf32, #tpu.memory_space<vmem>>, vector<8x1xf32>
    %4 = vector.broadcast %3 : vector<8x1xf32> to vector<8x128xf32>
    %5 = arith.addf %2, %4 : vector<8x128xf32>
    %c0_5 = arith.constant 0 : index
    %c0_6 = arith.constant 0 : index
    %6 = vector.load %arg4[%c0_5, %c0_6] : memref<8x128xf32, #tpu.memory_space<vmem>>, vector<8x128xf32>
    tpu.vector_store %arg4[%c0_5, %c0_6], %5 {strides = array<i32>} : memref<8x128xf32, #tpu.memory_space<vmem>>, vector<8x128xf32>,
    return
  }
  func.func @transform_0(%arg0: i32) -> (i32, i32) {
    %c0_i32 = arith.constant 0 : i32
    %c0_i32_0 = arith.constant 0 : i32
    %c0_i32_1 = arith.constant 0 : i32
    return %c0_i32, %c0_i32_0 : i32, i32
  }
  func.func @transform_1(%arg0: i32) -> (i32, i32) {
    %c0_i32 = arith.constant 0 : i32
    %c0_i32_0 = arith.constant 0 : i32
    %c0_i32_1 = arith.constant 0 : i32
    return %c0_i32, %c0_i32_0 : i32, i32
  }
  func.func @transform_2(%arg0: i32) -> (i32, i32) {
    %c0_i32 = arith.constant 0 : i32
    %c0_i32_0 = arith.constant 0 : i32
    return %c0_i32, %arg0 : i32, i32
  }
  func.func @transform_3(%arg0: i32) -> (i32, i32) {
    %c0_i32 = arith.constant 0 : i32
    %c0_i32_0 = arith.constant 0 : i32
    return %c0_i32, %arg0 : i32, i32
  }
}

</mosaic_0001>

<bundles_post_ra>
// kernel: tpu_custom_call.1
= control target key start
LH: loop header
LB: loop body
LE: loop exit
PB: predicated region body
PF: predicated region fallthrough
CT: control target
= control target key end

     0   :  { %8 = vsyncpa [#allocation3], 0  ;;  %s290_s0 = inlined_call_operand.vmem [shape: f32[8,64], index: 0, kind: input, shape index: {}]   ;;  %s291_s1 = inlined_call_operand.vmem [shape: f32[8,1], index: 1, kind: input, shape index: {}]   ;;  %s292_s2 = inlined_call_operand.hbm [shape: f32[64,128], index: 2, kind: input, shape index: {}]   ;;  %s293_s3 = inlined_call_operand.hbm [shape: f32[8,128], index: 3, kind: output, shape index: {}]  }
   0x1   :  { %9 = vsyncpa [#allocation4], 0  ;;  %s232_s12 = smov [#allocation2]   ;;  %s184_s16 = scalar_lea.hbm %s292_s2, 1024 }
   0x2   :  { %s19_s13 = sshll.u32 %s232_s12, 4  ;;  %p185_p0 = scmp.ne.s32.totalorder %s292_s2, %s184_s16  ;;  %s20_s13 = int_to_ptr.vmem [resolvable:$true] %s19_s13 }
   0x3   :  { %p188_p1 = scmp.lt.u32.totalorder %s184_s16, %s292_s2 }
   0x5   :  { %p190_p2 = pnand %p188_p1, %p185_p0 }
   0x7   :  { %193 = shalt.err (!%p190_p2)
}
   0x8   :  { %s194_s21 = scalar_lea.vmem %s20_s13, 1024  ;;  %p199_p4 = scmp.lt.s32.totalorder %s20_s13, %s20_s13 }
   0x9   :  { %p195_p3 = scmp.ne.s32.totalorder %s20_s13, %s194_s21  ;;  %p200_p5 = scmp.lt.s32.totalorder %s194_s21, %s194_s21 }
   0xb   :  { %p201_p6 = por %p200_p5, %p199_p4 }
   0xd   :  { %p202_p7 = pnand %p201_p6, %p195_p3 }
   0xf   :  { %205 = shalt.err (!%p202_p7)
}
  0x10   :  { %s233_s22 = smov 128   ;;  %s234_s23 = smov 8  }
  0x11   :  { %25 = dma.hbm_to_vmem [thread:$0]  %s292_s2, 1024, %s20_s13, [#allocation3], %s233_s22, %s233_s22, %s234_s23  }
  0x12   :  { %228 = dma.done.wait [#allocation3], 1024  }
  0x13   :  { %229 = vsyncadd [#allocation3], 4294966272  ;;  %v235_v0 = vmov 0.0|0.0   ;;  %vm236_vm0 = vmmov 0   ;;  %v237_v1 = vmov 0.0   ;;  %v238_v2 = vmov 0  }
  0x14   :  { %163 = vmatprep.subr.bf16.mxu0 %v235_v0  ;;  %160 = vmatprep.mubr.msk.f32.mxu0 %vm236_vm0, %v237_v1  ;;  %v30_v3 = vld [vmem:[#allocation2] sm:$0xff]  ;;  %v31_v4 = vld [vmem:[#allocation2 + $0x8] sm:$0xff]  ;;  %v32_v5 = vld [vmem:[#allocation2 + $0x10] sm:$0xff]  ;;  %vm44_vm1 = vcmask 523264  }
  0x15   :  { %183 = vset.pattern.permute.xlu0 %v238_v2  ;;  %v164_v6 = vpack.c.bf16 %v31_v4, %v30_v3  ;;  %v33_v7 = vld [vmem:[#allocation2 + $0x18] sm:$0xff]  ;;  %v38_v9 = vld [vmem:[%s291_s1] sm:$0xff]  ;;  %v35_v11 = vld [vmem:[#allocation2 + $0x28] sm:$0xff]  ;;  %s239_s1 = smov [#allocation5]  }
  0x16   :  { %v167_v8 = vpack.c.bf16 %v33_v7, %v32_v5  ;;  %v34_v10 = vld [vmem:[#allocation2 + $0x20] sm:$0xff]  ;;  %41 = vperm.xlu0 %183, %v38_v9   ;;  %v36_v13 = vld [vmem:[#allocation2 + $0x30] sm:$0xff]  ;;  %v37_v14 = vld [vmem:[#allocation2 + $0x38] sm:$0xff]  ;;  %s125_s29 = sshll.u32 %s239_s1, 4  ;;  %s126_s29 = int_to_ptr.vmem [resolvable:$true] %s125_s29 }
  0x17   :  { %165 = vmatpush3.bf16.msra.mxu0 %v164_v6  ;;  %v170_v12 = vpack.c.bf16 %v35_v11, %v34_v10  ;;  %v173_v15 = vpack.c.bf16 %v37_v14, %v36_v13  ;;  %v29_v16 = vld [vmem:[%s290_s0] sm:$0xff]  ;;  %s206_s30 = scalar_lea.vmem %s126_s29, 128  ;;  %p211_p9 = scmp.lt.s32.totalorder %s126_s29, %s126_s29 }
  0x18   :  { %166 = vmatprep.subr.bf16.mxu0 %v235_v0  ;;  %p207_p8 = scmp.ne.s32.totalorder %s126_s29, %s206_s30  ;;  %p212_p10 = scmp.lt.s32.totalorder %s206_s30, %s206_s30 }
  0x1a   :  { %p213_p11 = por %p212_p10, %p211_p9 }
  0x1b   :  { %168 = vmatpush3.bf16.msra.mxu0 %v167_v8 }
  0x1c   :  { %169 = vmatprep.subr.bf16.mxu0 %v235_v0  ;;  %p214_p12 = pnand %p213_p11, %p207_p8 }
  0x1f   :  { %171 = vmatpush3.bf16.msra.mxu0 %v170_v12 }
  0x20   :  { %172 = vmatprep.subr.bf16.mxu0 %v235_v0 }
  0x23   :  { %174 = vmatpush3.bf16.msra.mxu0 %v173_v15 }
  0x26   :  { %161 = vmatmul.mubr.msk.f32.vlgmr.msra.gmra.mrb[0].mxu0 %vm44_vm1, %v29_v16 }
  0x95   :  { %v42_v17 = vpop.permute.xlu0 %41 }
  0xf9   :  { %v114_v18 = vpop.f32.mrb[0].mxu0 }
  0xfa   :  { %v115_v19 = vadd.f32 %v114_v18, %v42_v17  ;;  %v162_v20 = vpop.f32.mrb[1].mxu0 }
  0xfc   :  { %118 = vst [vmem:[#allocation5] sm:$0xff] %v115_v19 }
  0xfd   :  { %217 = shalt.err (!%p214_p12)
}
  0xfe   :  { %s218_s0 = scalar_lea.hbm %s293_s3, 128 }
  0xff   :  { %p219_p13 = scmp.ne.s32.totalorder %s293_s3, %s218_s0  ;;  %p222_p0 = scmp.lt.u32.totalorder %s218_s0, %s293_s3 }
 0x101   :  { %p224_p1 = pnand %p222_p0, %p219_p13 }
 0x103   :  { %227 = shalt.err (!%p224_p1)
}
 0x104   :  { %128 = dma.vmem_to_hbm [thread:$0]  %s126_s29, 128, %s293_s3, [#allocation4]  }
 0x105   :  { %230 = dma.done.wait [#allocation4], 128  }
 0x106   :  { %231 = vsyncadd [#allocation4], 4294967168 }
 0x107   :  { %132 = vsyncpa [#allocation3], 1 }
 0x108   :  { %133 = vsyncpa [#allocation4], 1 }

// kernel: tpu_custom_call.1
= control target key start
LH: loop header
LB: loop body
LE: loop exit
PB: predicated region body
PF: predicated region fallthrough
CT: control target
= control target key end

     0   :  { %8 = vsyncpa [#allocation3], 0  ;;  %s290_s0 = inlined_call_operand.vmem [shape: f32[8,64], index: 0, kind: input, shape index: {}]   ;;  %s291_s1 = inlined_call_operand.vmem [shape: f32[8,1], index: 1, kind: input, shape index: {}]   ;;  %s292_s2 = inlined_call_operand.hbm [shape: f32[64,128], index: 2, kind: input, shape index: {}]   ;;  %s293_s3 = inlined_call_operand.hbm [shape: f32[8,128], index: 3, kind: output, shape index: {}]  }
   0x1   :  { %9 = vsyncpa [#allocation4], 0  ;;  %s232_s12 = smov [#allocation2]   ;;  %s184_s16 = scalar_lea.hbm %s292_s2, 1024 }
   0x2   :  { %s19_s13 = sshll.u32 %s232_s12, 4  ;;  %p185_p0 = scmp.ne.s32.totalorder %s292_s2, %s184_s16  ;;  %s20_s13 = int_to_ptr.vmem [resolvable:$true] %s19_s13 }
   0x3   :  { %p188_p1 = scmp.lt.u32.totalorder %s184_s16, %s292_s2 }
   0x5   :  { %p190_p2 = pnand %p188_p1, %p185_p0 }
   0x7   :  { %193 = shalt.err (!%p190_p2)
}
   0x8   :  { %s194_s21 = scalar_lea.vmem %s20_s13, 1024  ;;  %p199_p4 = scmp.lt.s32.totalorder %s20_s13, %s20_s13 }
   0x9   :  { %p195_p3 = scmp.ne.s32.totalorder %s20_s13, %s194_s21  ;;  %p200_p5 = scmp.lt.s32.totalorder %s194_s21, %s194_s21 }
   0xb   :  { %p201_p6 = por %p200_p5, %p199_p4 }
   0xd   :  { %p202_p7 = pnand %p201_p6, %p195_p3 }
   0xf   :  { %205 = shalt.err (!%p202_p7)
}
  0x10   :  { %s233_s22 = smov 128   ;;  %s234_s23 = smov 8  }
  0x11   :  { %25 = dma.hbm_to_vmem [thread:$0]  %s292_s2, 1024, %s20_s13, [#allocation3], %s233_s22, %s233_s22, %s234_s23  }
  0x12   :  { %228 = dma.done.wait [#allocation3], 1024  }
  0x13   :  { %229 = vsyncadd [#allocation3], 4294966272  ;;  %v235_v0 = vmov 0.0|0.0   ;;  %vm236_vm0 = vmmov 0   ;;  %v237_v1 = vmov 0.0   ;;  %v238_v2 = vmov 0  }
  0x14   :  { %163 = vmatprep.subr.bf16.mxu0 %v235_v0  ;;  %160 = vmatprep.mubr.msk.f32.mxu0 %vm236_vm0, %v237_v1  ;;  %v30_v3 = vld [vmem:[#allocation2] sm:$0xff]  ;;  %v31_v4 = vld [vmem:[#allocation2 + $0x8] sm:$0xff]  ;;  %v32_v5 = vld [vmem:[#allocation2 + $0x10] sm:$0xff]  ;;  %vm44_vm1 = vcmask 523264  }
  0x15   :  { %183 = vset.pattern.permute.xlu0 %v238_v2  ;;  %v164_v6 = vpack.c.bf16 %v31_v4, %v30_v3  ;;  %v33_v7 = vld [vmem:[#allocation2 + $0x18] sm:$0xff]  ;;  %v38_v9 = vld [vmem:[%s291_s1] sm:$0xff]  ;;  %v35_v11 = vld [vmem:[#allocation2 + $0x28] sm:$0xff]  ;;  %s239_s1 = smov [#allocation5]  }
  0x16   :  { %v167_v8 = vpack.c.bf16 %v33_v7, %v32_v5  ;;  %v34_v10 = vld [vmem:[#allocation2 + $0x20] sm:$0xff]  ;;  %41 = vperm.xlu0 %183, %v38_v9   ;;  %v36_v13 = vld [vmem:[#allocation2 + $0x30] sm:$0xff]  ;;  %v37_v14 = vld [vmem:[#allocation2 + $0x38] sm:$0xff]  ;;  %s125_s29 = sshll.u32 %s239_s1, 4  ;;  %s126_s29 = int_to_ptr.vmem [resolvable:$true] %s125_s29 }
  0x17   :  { %165 = vmatpush3.bf16.msra.mxu0 %v164_v6  ;;  %v170_v12 = vpack.c.bf16 %v35_v11, %v34_v10  ;;  %v173_v15 = vpack.c.bf16 %v37_v14, %v36_v13  ;;  %v29_v16 = vld [vmem:[%s290_s0] sm:$0xff]  ;;  %s206_s30 = scalar_lea.vmem %s126_s29, 128  ;;  %p211_p9 = scmp.lt.s32.totalorder %s126_s29, %s126_s29 }
  0x18   :  { %166 = vmatprep.subr.bf16.mxu0 %v235_v0  ;;  %p207_p8 = scmp.ne.s32.totalorder %s126_s29, %s206_s30  ;;  %p212_p10 = scmp.lt.s32.totalorder %s206_s30, %s206_s30 }
  0x1a   :  { %p213_p11 = por %p212_p10, %p211_p9 }
  0x1b   :  { %168 = vmatpush3.bf16.msra.mxu0 %v167_v8 }
  0x1c   :  { %169 = vmatprep.subr.bf16.mxu0 %v235_v0  ;;  %p214_p12 = pnand %p213_p11, %p207_p8 }
  0x1f   :  { %171 = vmatpush3.bf16.msra.mxu0 %v170_v12 }
  0x20   :  { %172 = vmatprep.subr.bf16.mxu0 %v235_v0 }
  0x23   :  { %174 = vmatpush3.bf16.msra.mxu0 %v173_v15 }
  0x26   :  { %161 = vmatmul.mubr.msk.f32.vlgmr.msra.gmra.mrb[0].mxu0 %vm44_vm1, %v29_v16 }
  0x95   :  { %v42_v17 = vpop.permute.xlu0 %41 }
  0xf9   :  { %v114_v18 = vpop.f32.mrb[0].mxu0 }
  0xfa   :  { %v115_v19 = vadd.f32 %v114_v18, %v42_v17  ;;  %v162_v20 = vpop.f32.mrb[1].mxu0 }
  0xfc   :  { %118 = vst [vmem:[#allocation5] sm:$0xff] %v115_v19 }
  0xfd   :  { %217 = shalt.err (!%p214_p12)
}
  0xfe   :  { %s218_s0 = scalar_lea.hbm %s293_s3, 128 }
  0xff   :  { %p219_p13 = scmp.ne.s32.totalorder %s293_s3, %s218_s0  ;;  %p222_p0 = scmp.lt.u32.totalorder %s218_s0, %s293_s3 }
 0x101   :  { %p224_p1 = pnand %p222_p0, %p219_p13 }
 0x103   :  { %227 = shalt.err (!%p224_p1)
}
 0x104   :  { %128 = dma.vmem_to_hbm [thread:$0]  %s126_s29, 128, %s293_s3, [#allocation4]  }
 0x105   :  { %230 = dma.done.wait [#allocation4], 128  }
 0x106   :  { %231 = vsyncadd [#allocation4], 4294967168 }
 0x107   :  { %132 = vsyncpa [#allocation3], 1 }
 0x108   :  { %133 = vsyncpa [#allocation4], 1 }

</bundles_post_ra>
